<compile_context>
chip_gen: v7x
topology: tpu7x:2x2x1
jax: 0.10.0
libtpu: 0.0.40
codegen_flags: <defaults>
</compile_context>

<pallas_src>
import jax
import jax.numpy as jnp
import numpy as np
from jax.experimental import pallas as pl
from jax.experimental.pallas import tpu as pltpu

VOCAB = 512
EMB_DIM = 32
NUM_INPUTS = 4
EPS = 1e-5  # PyTorch BatchNorm default


def actor_kernel(idx_ref, emb_ref, w1_ref, b1_ref, w2_ref, b2_ref,
                 w3_ref, b3_ref, out_ref, x_scratch):
    idx_col = idx_ref[...]                    # (4B, 1) int32, row = c*B + b
    rows = idx_col.shape[0]
    B = rows // NUM_INPUTS
    emb = emb_ref[...]                        # (512, 32) f32

    # --- fused embedding lookup: one hoisted iota, one one-hot, one MXU call ---
    iota = jax.lax.broadcasted_iota(jnp.int32, (rows, VOCAB), 1)       # built once
    onehot = (idx_col == iota).astype(jnp.float32)                     # (4B, 512)
    e_all = jnp.dot(onehot, emb, preferred_element_type=jnp.float32)   # (4B, 32)

    # --- BatchNorm1d(4), training mode: per-channel stats over (B, 32) ---
    inv_n = 1.0 / float(B * EMB_DIM)
    for c in range(NUM_INPUTS):               # static 4-iteration loop
        ec = e_all[c * B:(c + 1) * B, :]                       # (B, 32) sublane slice
        s = jnp.sum(ec, keepdims=True)                         # (1, 1)
        ss = jnp.sum(ec * ec, keepdims=True)                   # (1, 1)  single pass
        mean = s * inv_n
        var = jnp.maximum(ss * inv_n - mean * mean, 0.0)       # clamp fp cancellation
        xhat = (ec - mean) * jax.lax.rsqrt(var + EPS)          # (B, 32)
        # Fold the (B,4,32) -> (B,128) view: channel c -> lanes [c*32, (c+1)*32).
        x_scratch[:, c * EMB_DIM:(c + 1) * EMB_DIM] = xhat

    # --- single K=128 linear1, then linear2, then mu (all sigmoid, EUP exp) ---
    x = x_scratch[...]                                          # (B, 128)
    h1 = jax.nn.sigmoid(
        jnp.dot(x, w1_ref[...], preferred_element_type=jnp.float32) + b1_ref[...])
    h2 = jax.nn.sigmoid(
        jnp.dot(h1, w2_ref[...], preferred_element_type=jnp.float32) + b2_ref[...])
    mu = jax.nn.sigmoid(
        jnp.dot(h2, w3_ref[...], preferred_element_type=jnp.float32) + b3_ref[...])
    out_ref[...] = mu.astype(out_ref.dtype)


def actor_forward(idx, params):
    """idx: (B, NUM_INPUTS) int32 token indices. Returns mu: (B, num_outputs) f32."""
    B = idx.shape[0]
    # Sublane-aligned per-channel slices inside the kernel need B % 8 == 0.
    assert B % 8 == 0, "batch must be a multiple of 8 (sublane alignment)"
    num_outputs = params["w3"].shape[1]
    # Transpose + flatten in the wrapper (plain XLA, free) so the kernel needs
    # no in-kernel reshape/transpose: row c*B + b holds idx[b, c].
    idx_col = idx.T.reshape(NUM_INPUTS * B, 1).astype(jnp.int32)
    vmem = lambda: pl.BlockSpec(memory_space=pltpu.MemorySpace.VMEM)
    return pl.pallas_call(
        actor_kernel,
        out_shape=jax.ShapeDtypeStruct((B, num_outputs), jnp.float32),
        in_specs=[vmem() for _ in range(8)],
        out_specs=vmem(),
        scratch_shapes=[pltpu.VMEM((B, NUM_INPUTS * EMB_DIM), jnp.float32)],
    )(idx_col, params["emb"], params["w1"], params["b1"],
      params["w2"], params["b2"], params["w3"], params["b3"])


def actor_reference(idx, params):
    """Pure-JAX reference of the PyTorch forward (train-mode bn0)."""
    e = params["emb"][idx]                                         # (B, 4, 32)
    mean = e.mean(axis=(0, 2), keepdims=True)
    var = ((e - mean) ** 2).mean(axis=(0, 2), keepdims=True)       # biased var
    xhat = (e - mean) * jax.lax.rsqrt(var + EPS)
    x = xhat.reshape(idx.shape[0], NUM_INPUTS * EMB_DIM)
    h1 = jax.nn.sigmoid(x @ params["w1"] + params["b1"])
    h2 = jax.nn.sigmoid(h1 @ params["w2"] + params["b2"])
    return jax.nn.sigmoid(h2 @ params["w3"] + params["b3"])


def init_params(key, hidden_size, num_outputs):
    """Deterministic synthetic parameters (shapes match the PyTorch module)."""
    ks = jax.random.split(key, 7)
    emb = jax.random.normal(ks[0], (VOCAB, EMB_DIM), jnp.float32)

    def linear(kw, kb, fan_in, fan_out):
        bound = 1.0 / (fan_in ** 0.5)
        w = jax.random.uniform(kw, (fan_in, fan_out), jnp.float32, -bound, bound)
        b = jax.random.uniform(kb, (1, fan_out), jnp.float32, -bound, bound)
        return w, b

    w1, b1 = linear(ks[1], ks[2], NUM_INPUTS * EMB_DIM, hidden_size)
    w2, b2 = linear(ks[3], ks[4], hidden_size, hidden_size)
    w3, b3 = linear(ks[5], ks[6], hidden_size, num_outputs)
    # self.mu.weight / self.mu.bias scaled by 0.1 in __init__
    w3 = w3 * 0.1
    b3 = b3 * 0.1
    return {"emb": emb, "w1": w1, "b1": b1, "w2": w2, "b2": b2,
            "w3": w3, "b3": b3}


if __name__ == "__main__":
    B = 8             # multiple of 8 -> sublane-aligned per-channel slices
    HIDDEN = 32
    NUM_OUTPUTS = 6   # action_space.shape[0]

    key = jax.random.PRNGKey(0)
    k_idx, k_param = jax.random.split(key)
    idx = jax.random.randint(k_idx, (B, NUM_INPUTS), 0, VOCAB, dtype=jnp.int32)
    params = init_params(k_param, HIDDEN, NUM_OUTPUTS)

    mu = actor_forward(idx, params)
    mu = jax.block_until_ready(mu)
    assert mu.shape == (B, NUM_OUTPUTS) and mu.dtype == jnp.float32

    ref = jax.block_until_ready(actor_reference(idx, params))
    assert np.allclose(np.asarray(mu), np.asarray(ref), atol=1e-4, rtol=1e-4)
    print("KERNEL_OK")
</pallas_src>

<mosaic_0001>
module attributes {stable_mosaic.version = 11 : i64} {
  func.func @actor_kernel(%arg0: memref<32x1xi32, #tpu.memory_space<vmem>>, %arg1: memref<512x32xf32, #tpu.memory_space<vmem>>, %arg2: memref<128x32xf32, #tpu.memory_space<vmem>>, %arg3: memref<1x32xf32, #tpu.memory_space<vmem>>, %arg4: memref<32x32xf32, #tpu.memory_space<vmem>>, %arg5: memref<1x32xf32, #tpu.memory_space<vmem>>, %arg6: memref<32x6xf32, #tpu.memory_space<vmem>>, %arg7: memref<1x6xf32, #tpu.memory_space<vmem>>, %arg8: memref<8x6xf32, #tpu.memory_space<vmem>>, %arg9: memref<8x128xf32, #tpu.memory_space<vmem>>) attributes {dimension_semantics = [], scalar_prefetch = 0 : i64, scratch_operands = 1 : i64, tpu.core_type = #tpu.core_type<tc>} {
    %c0 = arith.constant 0 : index
    %c0_0 = arith.constant 0 : index
    %0 = vector.load %arg0[%c0, %c0_0] : memref<32x1xi32, #tpu.memory_space<vmem>>, vector<32x1xi32>
    %c0_1 = arith.constant 0 : index
    %c0_2 = arith.constant 0 : index
    %1 = vector.load %arg1[%c0_1, %c0_2] : memref<512x32xf32, #tpu.memory_space<vmem>>, vector<512x32xf32>
    %2 = tpu.iota {dimensions = array<i32: 1>} : vector<32x512xi32>
    %3 = vector.broadcast %0 : vector<32x1xi32> to vector<32x512xi32>
    %4 = arith.cmpi eq, %3, %2 : vector<32x512xi32>
    %5 = arith.extui %4 : vector<32x512xi1> to vector<32x512xi32>
    %6 = arith.sitofp %5 : vector<32x512xi32> to vector<32x512xf32>
    %cst = arith.constant dense<0.000000e+00> : vector<32x32xf32>
    %7 = tpu.matmul %6, %1, %cst {dimension_numbers = #tpu.dot_dimension_numbers<[1], [0], [0], [1], [0, 0, 1, 1], [], []>} : vector<32x512xf32>, vector<512x32xf32>, vector<32x32xf32> -> vector<32x32xf32>
    %8 = vector.extract_strided_slice %7 {offsets = [0, 0], sizes = [8, 32], strides = [1, 1]} : vector<32x32xf32> to vector<8x32xf32>
    %9 = vector.shape_cast %8 : vector<8x32xf32> to vector<1x8x32xf32>
    %cst_3 = arith.constant dense<0.000000e+00> : vector<1xf32>
    %10 = vector.multi_reduction <add>, %9, %cst_3 [1, 2] : vector<1x8x32xf32> to vector<1xf32>
    %11 = vector.shape_cast %10 : vector<1xf32> to vector<1x1x1xf32>
    %12 = vector.extract %11[0, 0, 0] : f32 from vector<1x1x1xf32>
    %13 = vector.broadcast %12 : f32 to vector<1x1xf32>
    %14 = arith.mulf %8, %8 : vector<8x32xf32>
    %15 = vector.shape_cast %14 : vector<8x32xf32> to vector<1x8x32xf32>
    %cst_4 = arith.constant dense<0.000000e+00> : vector<1xf32>
    %16 = vector.multi_reduction <add>, %15, %cst_4 [1, 2] : vector<1x8x32xf32> to vector<1xf32>
    %17 = vector.shape_cast %16 : vector<1xf32> to vector<1x1x1xf32>
    %18 = vector.extract %17[0, 0, 0] : f32 from vector<1x1x1xf32>
    %19 = vector.broadcast %18 : f32 to vector<1x1xf32>
    %cst_5 = arith.constant 3.906250e-03 : f32
    %20 = vector.broadcast %cst_5 : f32 to vector<1x1xf32>
    %21 = arith.mulf %13, %20 : vector<1x1xf32>
    %cst_6 = arith.constant 3.906250e-03 : f32
    %22 = vector.broadcast %cst_6 : f32 to vector<1x1xf32>
    %23 = arith.mulf %19, %22 : vector<1x1xf32>
    %24 = arith.mulf %21, %21 : vector<1x1xf32>
    %25 = arith.subf %23, %24 : vector<1x1xf32>
    %cst_7 = arith.constant 0.000000e+00 : f32
    %26 = vector.broadcast %cst_7 : f32 to vector<1x1xf32>
    %27 = arith.maximumf %25, %26 : vector<1x1xf32>
    %28 = vector.broadcast %21 : vector<1x1xf32> to vector<8x32xf32>
    %29 = arith.subf %8, %28 : vector<8x32xf32>
    %cst_8 = arith.constant 9.99999974E-6 : f32
    %30 = vector.broadcast %cst_8 : f32 to vector<1x1xf32>
    %31 = arith.addf %27, %30 : vector<1x1xf32>
    %32 = math.rsqrt %31 : vector<1x1xf32>
    %33 = vector.broadcast %32 : vector<1x1xf32> to vector<8x32xf32>
    %34 = arith.mulf %29, %33 : vector<8x32xf32>
    %c0_9 = arith.constant 0 : index
    %c0_10 = arith.constant 0 : index
    %35 = vector.load %arg9[%c0_9, %c0_10] : memref<8x128xf32, #tpu.memory_space<vmem>>, vector<8x32xf32>
    tpu.vector_store %arg9[%c0_9, %c0_10], %34 {strides = array<i32>} : memref<8x128xf32, #tpu.memory_space<vmem>>, vector<8x32xf32>,
    %36 = vector.extract_strided_slice %7 {offsets = [8, 0], sizes = [8, 32], strides = [1, 1]} : vector<32x32xf32> to vector<8x32xf32>
    %37 = vector.shape_cast %36 : vector<8x32xf32> to vector<1x8x32xf32>
    %cst_11 = arith.constant dense<0.000000e+00> : vector<1xf32>
    %38 = vector.multi_reduction <add>, %37, %cst_11 [1, 2] : vector<1x8x32xf32> to vector<1xf32>
    %39 = vector.shape_cast %38 : vector<1xf32> to vector<1x1x1xf32>
    %40 = vector.extract %39[0, 0, 0] : f32 from vector<1x1x1xf32>
    %41 = vector.broadcast %40 : f32 to vector<1x1xf32>
    %42 = arith.mulf %36, %36 : vector<8x32xf32>
    %43 = vector.shape_cast %42 : vector<8x32xf32> to vector<1x8x32xf32>
    %cst_12 = arith.constant dense<0.000000e+00> : vector<1xf32>
    %44 = vector.multi_reduction <add>, %43, %cst_12 [1, 2] : vector<1x8x32xf32> to vector<1xf32>
    %45 = vector.shape_cast %44 : vector<1xf32> to vector<1x1x1xf32>
    %46 = vector.extract %45[0, 0, 0] : f32 from vector<1x1x1xf32>
    %47 = vector.broadcast %46 : f32 to vector<1x1xf32>
    %cst_13 = arith.constant 3.906250e-03 : f32
    %48 = vector.broadcast %cst_13 : f32 to vector<1x1xf32>
    %49 = arith.mulf %41, %48 : vector<1x1xf32>
    %cst_14 = arith.constant 3.906250e-03 : f32
    %50 = vector.broadcast %cst_14 : f32 to vector<1x1xf32>
    %51 = arith.mulf %47, %50 : vector<1x1xf32>
    %52 = arith.mulf %49, %49 : vector<1x1xf32>
    %53 = arith.subf %51, %52 : vector<1x1xf32>
    %cst_15 = arith.constant 0.000000e+00 : f32
    %54 = vector.broadcast %cst_15 : f32 to vector<1x1xf32>
    %55 = arith.maximumf %53, %54 : vector<1x1xf32>
    %56 = vector.broadcast %49 : vector<1x1xf32> to vector<8x32xf32>
    %57 = arith.subf %36, %56 : vector<8x32xf32>
    %cst_16 = arith.constant 9.99999974E-6 : f32
    %58 = vector.broadcast %cst_16 : f32 to vector<1x1xf32>
    %59 = arith.addf %55, %58 : vector<1x1xf32>
    %60 = math.rsqrt %59 : vector<1x1xf32>
    %61 = vector.broadcast %60 : vector<1x1xf32> to vector<8x32xf32>
    %62 = arith.mulf %57, %61 : vector<8x32xf32>
    %c0_17 = arith.constant 0 : index
    %c32 = arith.constant 32 : index
    %63 = vector.load %arg9[%c0_17, %c32] : memref<8x128xf32, #tpu.memory_space<vmem>>, vector<8x32xf32>
    tpu.vector_store %arg9[%c0_17, %c32], %62 {strides = array<i32>} : memref<8x128xf32, #tpu.memory_space<vmem>>, vector<8x32xf32>,
    %64 = vector.extract_strided_slice %7 {offsets = [16, 0], sizes = [8, 32], strides = [1, 1]} : vector<32x32xf32> to vector<8x32xf32>
    %65 = vector.shape_cast %64 : vector<8x32xf32> to vector<1x8x32xf32>
    %cst_18 = arith.constant dense<0.000000e+00> : vector<1xf32>
    %66 = vector.multi_reduction <add>, %65, %cst_18 [1, 2] : vector<1x8x32xf32> to vector<1xf32>
    %67 = vector.shape_cast %66 : vector<1xf32> to vector<1x1x1xf32>
    %68 = vector.extract %67[0, 0, 0] : f32 from vector<1x1x1xf32>
    %69 = vector.broadcast %68 : f32 to vector<1x1xf32>
    %70 = arith.mulf %64, %64 : vector<8x32xf32>
    %71 = vector.shape_cast %70 : vector<8x32xf32> to vector<1x8x32xf32>
    %cst_19 = arith.constant dense<0.000000e+00> : vector<1xf32>
    %72 = vector.multi_reduction <add>, %71, %cst_19 [1, 2] : vector<1x8x32xf32> to vector<1xf32>
    %73 = vector.shape_cast %72 : vector<1xf32> to vector<1x1x1xf32>
    %74 = vector.extract %73[0, 0, 0] : f32 from vector<1x1x1xf32>
    %75 = vector.broadcast %74 : f32 to vector<1x1xf32>
    %cst_20 = arith.constant 3.906250e-03 : f32
    %76 = vector.broadcast %cst_20 : f32 to vector<1x1xf32>
    %77 = arith.mulf %69, %76 : vector<1x1xf32>
    %cst_21 = arith.constant 3.906250e-03 : f32
    %78 = vector.broadcast %cst_21 : f32 to vector<1x1xf32>
    %79 = arith.mulf %75, %78 : vector<1x1xf32>
    %80 = arith.mulf %77, %77 : vector<1x1xf32>
    %81 = arith.subf %79, %80 : vector<1x1xf32>
    %cst_22 = arith.constant 0.000000e+00 : f32
    %82 = vector.broadcast %cst_22 : f32 to vector<1x1xf32>
    %83 = arith.maximumf %81, %82 : vector<1x1xf32>
    %84 = vector.broadcast %77 : vector<1x1xf32> to vector<8x32xf32>
    %85 = arith.subf %64, %84 : vector<8x32xf32>
    %cst_23 = arith.constant 9.99999974E-6 : f32
    %86 = vector.broadcast %cst_23 : f32 to vector<1x1xf32>
    %87 = arith.addf %83, %86 : vector<1x1xf32>
    %88 = math.rsqrt %87 : vector<1x1xf32>
    %89 = vector.broadcast %88 : vector<1x1xf32> to vector<8x32xf32>
    %90 = arith.mulf %85, %89 : vector<8x32xf32>
    %c0_24 = arith.constant 0 : index
    %c64 = arith.constant 64 : index
    %91 = vector.load %arg9[%c0_24, %c64] : memref<8x128xf32, #tpu.memory_space<vmem>>, vector<8x32xf32>
    tpu.vector_store %arg9[%c0_24, %c64], %90 {strides = array<i32>} : memref<8x128xf32, #tpu.memory_space<vmem>>, vector<8x32xf32>,
    %92 = vector.extract_strided_slice %7 {offsets = [24, 0], sizes = [8, 32], strides = [1, 1]} : vector<32x32xf32> to vector<8x32xf32>
    %93 = vector.shape_cast %92 : vector<8x32xf32> to vector<1x8x32xf32>
    %cst_25 = arith.constant dense<0.000000e+00> : vector<1xf32>
    %94 = vector.multi_reduction <add>, %93, %cst_25 [1, 2] : vector<1x8x32xf32> to vector<1xf32>
    %95 = vector.shape_cast %94 : vector<1xf32> to vector<1x1x1xf32>
    %96 = vector.extract %95[0, 0, 0] : f32 from vector<1x1x1xf32>
    %97 = vector.broadcast %96 : f32 to vector<1x1xf32>
    %98 = arith.mulf %92, %92 : vector<8x32xf32>
    %99 = vector.shape_cast %98 : vector<8x32xf32> to vector<1x8x32xf32>
    %cst_26 = arith.constant dense<0.000000e+00> : vector<1xf32>
    %100 = vector.multi_reduction <add>, %99, %cst_26 [1, 2] : vector<1x8x32xf32> to vector<1xf32>
    %101 = vector.shape_cast %100 : vector<1xf32> to vector<1x1x1xf32>
    %102 = vector.extract %101[0, 0, 0] : f32 from vector<1x1x1xf32>
    %103 = vector.broadcast %102 : f32 to vector<1x1xf32>
    %cst_27 = arith.constant 3.906250e-03 : f32
    %104 = vector.broadcast %cst_27 : f32 to vector<1x1xf32>
    %105 = arith.mulf %97, %104 : vector<1x1xf32>
    %cst_28 = arith.constant 3.906250e-03 : f32
    %106 = vector.broadcast %cst_28 : f32 to vector<1x1xf32>
    %107 = arith.mulf %103, %106 : vector<1x1xf32>
    %108 = arith.mulf %105, %105 : vector<1x1xf32>
    %109 = arith.subf %107, %108 : vector<1x1xf32>
    %cst_29 = arith.constant 0.000000e+00 : f32
    %110 = vector.broadcast %cst_29 : f32 to vector<1x1xf32>
    %111 = arith.maximumf %109, %110 : vector<1x1xf32>
    %112 = vector.broadcast %105 : vector<1x1xf32> to vector<8x32xf32>
    %113 = arith.subf %92, %112 : vector<8x32xf32>
    %cst_30 = arith.constant 9.99999974E-6 : f32
    %114 = vector.broadcast %cst_30 : f32 to vector<1x1xf32>
    %115 = arith.addf %111, %114 : vector<1x1xf32>
    %116 = math.rsqrt %115 : vector<1x1xf32>
    %117 = vector.broadcast %116 : vector<1x1xf32> to vector<8x32xf32>
    %118 = arith.mulf %113, %117 : vector<8x32xf32>
    %c0_31 = arith.constant 0 : index
    %c96 = arith.constant 96 : index
    %119 = vector.load %arg9[%c0_31, %c96] : memref<8x128xf32, #tpu.memory_space<vmem>>, vector<8x32xf32>
    tpu.vector_store %arg9[%c0_31, %c96], %118 {strides = array<i32>} : memref<8x128xf32, #tpu.memory_space<vmem>>, vector<8x32xf32>,
    %c0_32 = arith.constant 0 : index
    %c0_33 = arith.constant 0 : index
    %120 = vector.load %arg9[%c0_32, %c0_33] : memref<8x128xf32, #tpu.memory_space<vmem>>, vector<8x128xf32>
    %c0_34 = arith.constant 0 : index
    %c0_35 = arith.constant 0 : index
    %121 = vector.load %arg2[%c0_34, %c0_35] : memref<128x32xf32, #tpu.memory_space<vmem>>, vector<128x32xf32>
    %cst_36 = arith.constant dense<0.000000e+00> : vector<8x32xf32>
    %122 = tpu.matmul %120, %121, %cst_36 {dimension_numbers = #tpu.dot_dimension_numbers<[1], [0], [0], [1], [0, 0, 1, 1], [], []>} : vector<8x128xf32>, vector<128x32xf32>, vector<8x32xf32> -> vector<8x32xf32>
    %c0_37 = arith.constant 0 : index
    %c0_38 = arith.constant 0 : index
    %123 = vector.load %arg3[%c0_37, %c0_38] : memref<1x32xf32, #tpu.memory_space<vmem>>, vector<1x32xf32>
    %124 = vector.broadcast %123 : vector<1x32xf32> to vector<8x32xf32>
    %125 = arith.addf %122, %124 : vector<8x32xf32>
    %126 = arith.negf %125 : vector<8x32xf32>
    %127 = math.exp %126 : vector<8x32xf32>
    %cst_39 = arith.constant 1.000000e+00 : f32
    %128 = vector.broadcast %cst_39 : f32 to vector<8x32xf32>
    %129 = arith.addf %128, %127 : vector<8x32xf32>
    %130 = arith.divf %128, %129 : vector<8x32xf32>
    %c0_40 = arith.constant 0 : index
    %c0_41 = arith.constant 0 : index
    %131 = vector.load %arg4[%c0_40, %c0_41] : memref<32x32xf32, #tpu.memory_space<vmem>>, vector<32x32xf32>
    %cst_42 = arith.constant dense<0.000000e+00> : vector<8x32xf32>
    %132 = tpu.matmul %130, %131, %cst_42 {dimension_numbers = #tpu.dot_dimension_numbers<[1], [0], [0], [1], [0, 0, 1, 1], [], []>} : vector<8x32xf32>, vector<32x32xf32>, vector<8x32xf32> -> vector<8x32xf32>
    %c0_43 = arith.constant 0 : index
    %c0_44 = arith.constant 0 : index
    %133 = vector.load %arg5[%c0_43, %c0_44] : memref<1x32xf32, #tpu.memory_space<vmem>>, vector<1x32xf32>
    %134 = vector.broadcast %133 : vector<1x32xf32> to vector<8x32xf32>
    %135 = arith.addf %132, %134 : vector<8x32xf32>
    %136 = arith.negf %135 : vector<8x32xf32>
    %137 = math.exp %136 : vector<8x32xf32>
    %cst_45 = arith.constant 1.000000e+00 : f32
    %138 = vector.broadcast %cst_45 : f32 to vector<8x32xf32>
    %139 = arith.addf %138, %137 : vector<8x32xf32>
    %140 = arith.divf %138, %139 : vector<8x32xf32>
    %c0_46 = arith.constant 0 : index
    %c0_47 = arith.constant 0 : index
    %141 = vector.load %arg6[%c0_46, %c0_47] : memref<32x6xf32, #tpu.memory_space<vmem>>, vector<32x6xf32>
    %cst_48 = arith.constant dense<0.000000e+00> : vector<8x6xf32>
    %142 = tpu.matmul %140, %141, %cst_48 {dimension_numbers = #tpu.dot_dimension_numbers<[1], [0], [0], [1], [0, 0, 1, 1], [], []>} : vector<8x32xf32>, vector<32x6xf32>, vector<8x6xf32> -> vector<8x6xf32>
    %c0_49 = arith.constant 0 : index
    %c0_50 = arith.constant 0 : index
    %143 = vector.load %arg7[%c0_49, %c0_50] : memref<1x6xf32, #tpu.memory_space<vmem>>, vector<1x6xf32>
    %144 = vector.broadcast %143 : vector<1x6xf32> to vector<8x6xf32>
    %145 = arith.addf %142, %144 : vector<8x6xf32>
    %146 = arith.negf %145 : vector<8x6xf32>
    %147 = math.exp %146 : vector<8x6xf32>
    %cst_51 = arith.constant 1.000000e+00 : f32
    %148 = vector.broadcast %cst_51 : f32 to vector<8x6xf32>
    %149 = arith.addf %148, %147 : vector<8x6xf32>
    %150 = arith.divf %148, %149 : vector<8x6xf32>
    %c0_52 = arith.constant 0 : index
    %c0_53 = arith.constant 0 : index
    %151 = vector.load %arg8[%c0_52, %c0_53] : memref<8x6xf32, #tpu.memory_space<vmem>>, vector<8x6xf32>
    tpu.vector_store %arg8[%c0_52, %c0_53], %150 {strides = array<i32>} : memref<8x6xf32, #tpu.memory_space<vmem>>, vector<8x6xf32>,
    return
  }
}

</mosaic_0001>

<bundles_post_ra>
// kernel: tpu_custom_call.1
= control target key start
LH: loop header
LB: loop body
LE: loop exit
PB: predicated region body
PF: predicated region fallthrough
CT: control target
= control target key end

     0   :  { %v1160_v2 = vmov 0   ;;  %s1561_s0 = inlined_call_operand.vmem [shape: s32[32,1], index: 0, kind: input, shape index: {}]   ;;  %s1562_s1 = inlined_call_operand.vmem [shape: f32[512,32], index: 1, kind: input, shape index: {}]   ;;  %s1563_s2 = inlined_call_operand.vmem [shape: f32[128,32], index: 2, kind: input, shape index: {}]   ;;  %s1564_s3 = inlined_call_operand.vmem [shape: f32[1,32], index: 3, kind: input, shape index: {}]   ;;  %s1565_s4 = inlined_call_operand.vmem [shape: f32[32,32], index: 4, kind: input, shape index: {}]   ;;  %s1566_s5 = inlined_call_operand.vmem [shape: f32[1,32], index: 5, kind: input, shape index: {}]   ;;  %s1567_s6 = inlined_call_operand.vmem [shape: f32[32,6], index: 6, kind: input, shape index: {}]   ;;  %s1568_s7 = inlined_call_operand.vmem [shape: f32[1,6], index: 7, kind: input, shape index: {}]   ;;  %s1569_s8 = inlined_call_operand.hbm [shape: f32[8,6], index: 8, kind: output, shape index: {}]  }
   0x1   :  { %v30_v0 = vld [vmem:[%s1561_s0] sm:$0xff]  ;;  %v32_v1 = vld [vmem:[%s1561_s0 + $0x10] sm:$0xff]  ;;  %1114 = vset.pattern.permute.xlu0 %v1160_v2  ;;  %v31_v3 = vld [vmem:[%s1561_s0 + $0x8] sm:$0xff]  ;;  %1115 = vset.pattern.permute.xlu1 %v1160_v2 }
   0x2   :  { %v33_v4 = vld [vmem:[%s1561_s0 + $0x18] sm:$0xff]  ;;  %v50_v5 = vld [vmem:[%s1562_s1 + $0x80] sm:$0xff]  ;;  %v51_v6 = vld [vmem:[%s1562_s1 + $0x88] sm:$0xff]  ;;  %104 = vperm.xlu0 %1114, %v30_v0   ;;  %110 = vperm.xlu1 %1115, %v32_v1  }
   0x3   :  { %v989_v7 = vpack.c.bf16 %v51_v6, %v50_v5  ;;  %v82_v8 = vld [vmem:[%s1562_s1 + $0x180] sm:$0xff]  ;;  %v83_v9 = vld [vmem:[%s1562_s1 + $0x188] sm:$0xff]  ;;  %v52_v17 = vld [vmem:[%s1562_s1 + $0x90] sm:$0xff] }
   0x4   :  { %v34_v10 = vld [vmem:[%s1562_s1] sm:$0xff]  ;;  %v1021_v11 = vpack.c.bf16 %v83_v9, %v82_v8  ;;  %v35_v12 = vld [vmem:[%s1562_s1 + $0x8] sm:$0xff]  ;;  %v53_v18 = vld [vmem:[%s1562_s1 + $0x98] sm:$0xff] }
   0x5   :  { %v66_v13 = vld [vmem:[%s1562_s1 + $0x100] sm:$0xff]  ;;  %v67_v14 = vld [vmem:[%s1562_s1 + $0x108] sm:$0xff]  ;;  %990 = vmatprep.subr.bf16.mxu0 %v989_v7  ;;  %v991_v15 = vpack.c.bf16 %v35_v12, %v34_v10  ;;  %v84_v19 = vld [vmem:[%s1562_s1 + $0x190] sm:$0xff]  ;;  %v993_v20 = vpack.c.bf16 %v53_v18, %v52_v17 }
   0x6   :  { %v1023_v16 = vpack.c.bf16 %v67_v14, %v66_v13  ;;  %1022 = vmatprep.subr.bf16.mxu1 %v1021_v11  ;;  %v85_v21 = vld [vmem:[%s1562_s1 + $0x198] sm:$0xff]  ;;  %v36_v22 = vld [vmem:[%s1562_s1 + $0x10] sm:$0xff]  ;;  %107 = vperm.xlu0 %1114, %v31_v3   ;;  %v54_v27 = vld [vmem:[%s1562_s1 + $0xa0] sm:$0xff] }
   0x7   :  { %v37_v23 = vld [vmem:[%s1562_s1 + $0x18] sm:$0xff]  ;;  %113 = vperm.xlu1 %1115, %v33_v4   ;;  %v1025_v24 = vpack.c.bf16 %v85_v21, %v84_v19  ;;  %v68_v25 = vld [vmem:[%s1562_s1 + $0x110] sm:$0xff]  ;;  %992 = vmatpush3.bf16.msra.mxu0 %v991_v15  ;;  %v55_v30 = vld [vmem:[%s1562_s1 + $0xa8] sm:$0xff] }
   0x8   :  { %v69_v26 = vld [vmem:[%s1562_s1 + $0x118] sm:$0xff]  ;;  %1024 = vmatpush3.bf16.msra.mxu1 %v1023_v16  ;;  %v995_v28 = vpack.c.bf16 %v37_v23, %v36_v22  ;;  %v86_v31 = vld [vmem:[%s1562_s1 + $0x1a0] sm:$0xff]  ;;  %v87_v32 = vld [vmem:[%s1562_s1 + $0x1a8] sm:$0xff]  ;;  %994 = vmatprep.subr.bf16.mxu0 %v993_v20  ;;  %v997_v33 = vpack.c.bf16 %v55_v30, %v54_v27 }
   0x9   :  { %v1027_v29 = vpack.c.bf16 %v69_v26, %v68_v25  ;;  %1026 = vmatprep.subr.bf16.mxu1 %v1025_v24  ;;  %v1029_v34 = vpack.c.bf16 %v87_v32, %v86_v31  ;;  %v38_v35 = vld [vmem:[%s1562_s1 + $0x20] sm:$0xff]  ;;  %v39_v36 = vld [vmem:[%s1562_s1 + $0x28] sm:$0xff]  ;;  %v56_v39 = vld [vmem:[%s1562_s1 + $0xb0] sm:$0xff] }
   0xa   :  { %v70_v37 = vld [vmem:[%s1562_s1 + $0x120] sm:$0xff]  ;;  %v71_v38 = vld [vmem:[%s1562_s1 + $0x128] sm:$0xff]  ;;  %v57_v40 = vld [vmem:[%s1562_s1 + $0xb8] sm:$0xff]  ;;  %v999_v43 = vpack.c.bf16 %v39_v36, %v38_v35 }
   0xb   :  { %v88_v41 = vld [vmem:[%s1562_s1 + $0x1b0] sm:$0xff]  ;;  %v89_v42 = vld [vmem:[%s1562_s1 + $0x1b8] sm:$0xff]  ;;  %996 = vmatpush3.bf16.msra.mxu0 %v995_v28  ;;  %v1031_v44 = vpack.c.bf16 %v71_v38, %v70_v37  ;;  %v1001_v47 = vpack.c.bf16 %v57_v40, %v56_v39  ;;  %v58_v51 = vld [vmem:[%s1562_s1 + $0xc0] sm:$0xff] }
   0xc   :  { %1028 = vmatpush3.bf16.msra.mxu1 %v1027_v29  ;;  %v40_v45 = vld [vmem:[%s1562_s1 + $0x30] sm:$0xff]  ;;  %v41_v46 = vld [vmem:[%s1562_s1 + $0x38] sm:$0xff]  ;;  %998 = vmatprep.subr.bf16.mxu0 %v997_v33  ;;  %v1033_v48 = vpack.c.bf16 %v89_v42, %v88_v41  ;;  %v59_v52 = vld [vmem:[%s1562_s1 + $0xc8] sm:$0xff] }
   0xd   :  { %1030 = vmatprep.subr.bf16.mxu1 %v1029_v34  ;;  %v72_v49 = vld [vmem:[%s1562_s1 + $0x130] sm:$0xff]  ;;  %v73_v50 = vld [vmem:[%s1562_s1 + $0x138] sm:$0xff]  ;;  %v90_v53 = vld [vmem:[%s1562_s1 + $0x1c0] sm:$0xff]  ;;  %v1003_v55 = vpack.c.bf16 %v41_v46, %v40_v45  ;;  %v1005_v59 = vpack.c.bf16 %v59_v52, %v58_v51 }
   0xe   :  { %v91_v54 = vld [vmem:[%s1562_s1 + $0x1c8] sm:$0xff]  ;;  %v1035_v56 = vpack.c.bf16 %v73_v50, %v72_v49  ;;  %v42_v57 = vld [vmem:[%s1562_s1 + $0x40] sm:$0xff]  ;;  %v60_v63 = vld [vmem:[%s1562_s1 + $0xd0] sm:$0xff] }
   0xf   :  { %1000 = vmatpush3.bf16.msra.mxu0 %v999_v43  ;;  %v43_v58 = vld [vmem:[%s1562_s1 + $0x48] sm:$0xff]  ;;  %v1037_v60 = vpack.c.bf16 %v91_v54, %v90_v53  ;;  %v74_v61 = vld [vmem:[%s1562_s1 + $0x140] sm:$0xff]  ;;  %v61_v0 = vld [vmem:[%s1562_s1 + $0xd8] sm:$0xff] }
  0x10   :  { %1032 = vmatpush3.bf16.msra.mxu1 %v1031_v44  ;;  %1002 = vmatprep.subr.bf16.mxu0 %v1001_v47  ;;  %v75_v62 = vld [vmem:[%s1562_s1 + $0x148] sm:$0xff]  ;;  %v92_v1 = vld [vmem:[%s1562_s1 + $0x1d0] sm:$0xff]  ;;  %v93_v2 = vld [vmem:[%s1562_s1 + $0x1d8] sm:$0xff]  ;;  %v1007_v3 = vpack.c.bf16 %v43_v58, %v42_v57  ;;  %v1009_v7 = vpack.c.bf16 %v61_v0, %v60_v63 }
  0x11   :  { %1034 = vmatprep.subr.bf16.mxu1 %v1033_v48  ;;  %v1039_v4 = vpack.c.bf16 %v75_v62, %v74_v61  ;;  %v44_v5 = vld [vmem:[%s1562_s1 + $0x50] sm:$0xff]  ;;  %v45_v6 = vld [vmem:[%s1562_s1 + $0x58] sm:$0xff]  ;;  %v1041_v8 = vpack.c.bf16 %v93_v2, %v92_v1  ;;  %v62_v11 = vld [vmem:[%s1562_s1 + $0xe0] sm:$0xff] }
  0x12   :  { %v76_v9 = vld [vmem:[%s1562_s1 + $0x150] sm:$0xff]  ;;  %v77_v10 = vld [vmem:[%s1562_s1 + $0x158] sm:$0xff]  ;;  %v63_v12 = vld [vmem:[%s1562_s1 + $0xe8] sm:$0xff] }
  0x13   :  { %1004 = vmatpush3.bf16.msra.mxu0 %v1003_v55  ;;  %v94_v13 = vld [vmem:[%s1562_s1 + $0x1e0] sm:$0xff]  ;;  %v95_v14 = vld [vmem:[%s1562_s1 + $0x1e8] sm:$0xff] }
  0x14   :  { %1036 = vmatpush3.bf16.msra.mxu1 %v1035_v56  ;;  %1006 = vmatprep.subr.bf16.mxu0 %v1005_v59 }
  0x15   :  { %1038 = vmatprep.subr.bf16.mxu1 %v1037_v60 }
  0x16   :  { %13 = vsyncpa [#allocation4], 0  ;;  %v1011_v15 = vpack.c.bf16 %v45_v6, %v44_v5  ;;  %v1043_v16 = vpack.c.bf16 %v77_v10, %v76_v9  ;;  %v46_v17 = vld [vmem:[%s1562_s1 + $0x60] sm:$0xff]  ;;  %v47_v18 = vld [vmem:[%s1562_s1 + $0x68] sm:$0xff]  ;;  %v1013_v19 = vpack.c.bf16 %v63_v12, %v62_v11  ;;  %v1045_v20 = vpack.c.bf16 %v95_v14, %v94_v13 }
  0x17   :  { %1008 = vmatpush3.bf16.msra.mxu0 %v1007_v3  ;;  %v78_v21 = vld [vmem:[%s1562_s1 + $0x160] sm:$0xff]  ;;  %v79_v22 = vld [vmem:[%s1562_s1 + $0x168] sm:$0xff]  ;;  %v64_v23 = vld [vmem:[%s1562_s1 + $0xf0] sm:$0xff]  ;;  %v1015_v27 = vpack.c.bf16 %v47_v18, %v46_v17  ;;  %v98_v37 = vlaneseq  ;;  %v1161_v44 = vmov 1.0  }
  0x18   :  { %1040 = vmatpush3.bf16.msra.mxu1 %v1039_v4  ;;  %1010 = vmatprep.subr.bf16.mxu0 %v1009_v7  ;;  %v65_v24 = vld [vmem:[%s1562_s1 + $0xf8] sm:$0xff]  ;;  %v96_v25 = vld [vmem:[%s1562_s1 + $0x1f0] sm:$0xff]  ;;  %v1047_v28 = vpack.c.bf16 %v79_v22, %v78_v21 }
  0x19   :  { %1042 = vmatprep.subr.bf16.mxu1 %v1041_v8  ;;  %v97_v26 = vld [vmem:[%s1562_s1 + $0x1f8] sm:$0xff]  ;;  %v48_v29 = vld [vmem:[%s1562_s1 + $0x70] sm:$0xff]  ;;  %v1017_v30 = vpack.c.bf16 %v65_v24, %v64_v23  ;;  %v99_v38 = vand.u32 127, %v98_v37  ;;  %v482_v23 = vld [vmem:[%s1563_s2] sm:$0xff] }
  0x1a   :  { %v1049_v31 = vpack.c.bf16 %v97_v26, %v96_v25  ;;  %v49_v32 = vld [vmem:[%s1562_s1 + $0x78] sm:$0xff]  ;;  %v80_v33 = vld [vmem:[%s1562_s1 + $0x170] sm:$0xff]  ;;  %v483_v24 = vld [vmem:[%s1563_s2 + $0x8] sm:$0xff]  ;;  %v1162_v26 = vmov 0.0|0.0  }
  0x1b   :  { %1012 = vmatpush3.bf16.msra.mxu0 %v1011_v15  ;;  %v81_v34 = vld [vmem:[%s1562_s1 + $0x178] sm:$0xff]  ;;  %v1019_v35 = vpack.c.bf16 %v49_v32, %v48_v29  ;;  %v100_v39 = vadd.s32 128, %v99_v38  ;;  %v102_v40 = vadd.s32 384, %v99_v38  ;;  %v101_v41 = vadd.s32 256, %v99_v38  ;;  %v484_v25 = vld [vmem:[%s1563_s2 + $0x10] sm:$0xff] }
  0x1c   :  { %1044 = vmatpush3.bf16.msra.mxu1 %v1043_v16  ;;  %1014 = vmatprep.subr.bf16.mxu0 %v1013_v19  ;;  %v1051_v36 = vpack.c.bf16 %v81_v34, %v80_v33  ;;  %v488_v33 = vld [vmem:[%s1563_s2 + $0x30] sm:$0xff]  ;;  %v489_v34 = vld [vmem:[%s1563_s2 + $0x38] sm:$0xff] }
  0x1d   :  { %1046 = vmatprep.subr.bf16.mxu1 %v1045_v20 }
  0x1f   :  { %1016 = vmatpush3.bf16.msra.mxu0 %v1015_v27  ;;  %v1054_v27 = vpack.c.bf16 %v483_v24, %v482_v23 }
  0x20   :  { %1048 = vmatpush3.bf16.msra.mxu1 %v1047_v28  ;;  %1018 = vmatprep.subr.bf16.mxu0 %v1017_v30  ;;  %v485_v28 = vld [vmem:[%s1563_s2 + $0x18] sm:$0xff]  ;;  %v486_v30 = vld [vmem:[%s1563_s2 + $0x20] sm:$0xff] }
  0x21   :  { %1050 = vmatprep.subr.bf16.mxu1 %v1049_v31  ;;  %v1057_v29 = vpack.c.bf16 %v485_v28, %v484_v25  ;;  %v487_v31 = vld [vmem:[%s1563_s2 + $0x28] sm:$0xff] }
  0x22   :  { %v1060_v32 = vpack.c.bf16 %v487_v31, %v486_v30 }
  0x23   :  { %1020 = vmatpush3.bf16.msra.mxu0 %v1019_v35  ;;  %v1063_v35 = vpack.c.bf16 %v489_v34, %v488_v33 }
  0x24   :  { %1052 = vmatpush3.bf16.msra.mxu1 %v1051_v36  ;;  %1053 = vmatprep.subr.bf16.mxu0 %v1162_v26 }
  0x25   :  { %1077 = vmatprep.subr.bf16.mxu1 %v1162_v26 }
  0x81   :  { %v105_v42 = vpop.permute.xlu0 %104  ;;  %v111_v43 = vpop.permute.xlu1 %110 }
  0x82   :  { %vm116_vm0 = vcmp.eq.s32.totalorder %v105_v42, %v100_v39  ;;  %vm118_vm1 = vcmp.eq.s32.totalorder %v105_v42, %v102_v40  ;;  %vm115_vm2 = vcmp.eq.s32.totalorder %v105_v42, %v99_v38  ;;  %vm117_vm3 = vcmp.eq.s32.totalorder %v105_v42, %v101_v41 }
  0x83   :  { %793 = vmatprep.mubr.msk.f32.mxu0 %vm116_vm0, %v1161_v44  ;;  %801 = vmatprep.mubr.msk.f32.mxu1 %vm118_vm1, %v1161_v44  ;;  %vm124_vm4 = vcmp.eq.s32.totalorder %v111_v43, %v100_v39  ;;  %vm126_vm5 = vcmp.eq.s32.totalorder %v111_v43, %v102_v40  ;;  %vm123_vm10 = vcmp.eq.s32.totalorder %v111_v43, %v99_v38  ;;  %vm333_vm0 = vcmask 261120  }
  0x84   :  { %794 = vmatmul.mubr.msk.f32.vlgmr.msra.gmra.mrb[0].mxu0 %vm115_vm2, %v1161_v44  ;;  %802 = vmatmul.mubr.msk.f32.vlgmr.msra.gmra.mrb[0].mxu1 %vm117_vm3, %v1161_v44  ;;  %vm125_vm11 = vcmp.eq.s32.totalorder %v111_v43, %v101_v41  ;;  %vm1163_vm1 = vmmov 0   ;;  %vm403_vm2 = vcmask 523520   ;;  %vm441_vm3 = vcmask 785920  }
  0x85   :  { %v108_v45 = vpop.permute.xlu0 %107  ;;  %1055 = vmatpush3.bf16.msra.mxu0 %v1054_v27 }
  0x86   :  { %vm120_vm6 = vcmp.eq.s32.totalorder %v108_v45, %v100_v39  ;;  %vm122_vm7 = vcmp.eq.s32.totalorder %v108_v45, %v102_v40  ;;  %vm119_vm8 = vcmp.eq.s32.totalorder %v108_v45, %v99_v38  ;;  %vm121_vm9 = vcmp.eq.s32.totalorder %v108_v45, %v101_v41  ;;  %v114_v46 = vpop.permute.xlu1 %113  ;;  %1056 = vmatprep.subr.bf16.mxu0 %v1162_v26 }
  0x87   :  { %795 = vmatprep.mubr.msk.f32.mxu0 %vm120_vm6, %v1161_v44  ;;  %803 = vmatprep.mubr.msk.f32.mxu1 %vm122_vm7, %v1161_v44  ;;  %vm128_vm12 = vcmp.eq.s32.totalorder %v114_v46, %v100_v39  ;;  %vm130_vm13 = vcmp.eq.s32.totalorder %v114_v46, %v102_v40  ;;  %vm127_vm14 = vcmp.eq.s32.totalorder %v114_v46, %v99_v38 }
  0x88   :  { %796 = vmatmul.mubr.msk.f32.gmra.mrb[2].mxu0 %vm119_vm8, %v1161_v44  ;;  %804 = vmatmul.mubr.msk.f32.gmra.mrb[2].mxu1 %vm121_vm9, %v1161_v44  ;;  %vm129_vm15 = vcmp.eq.s32.totalorder %v114_v46, %v101_v41 }
  0x89   :  { %797 = vmatprep.mubr.msk.f32.mxu0 %vm124_vm4, %v1161_v44  ;;  %805 = vmatprep.mubr.msk.f32.mxu1 %vm126_vm5, %v1161_v44  ;;  %vm479_vm4 = vcmask 1048320   ;;  %vm761_vm5 = vcmask 48128  }
  0x8a   :  { %1058 = vmatpush3.bf16.msra.mxu0 %v1057_v29 }
  0x8b   :  { %1059 = vmatprep.subr.bf16.mxu0 %v1162_v26 }
  0x8c   :  { %798 = vmatmul.mubr.msk.f32.gmra.mrb[4].mxu0 %vm123_vm10, %v1161_v44  ;;  %806 = vmatmul.mubr.msk.f32.gmra.mrb[4].mxu1 %vm125_vm11, %v1161_v44 }
  0x8d   :  { %799 = vmatprep.mubr.msk.f32.mxu0 %vm128_vm12, %v1161_v44  ;;  %807 = vmatprep.mubr.msk.f32.mxu1 %vm130_vm13, %v1161_v44 }
  0x8e   :  { %1061 = vmatpush3.bf16.msra.mxu0 %v1060_v32 }
  0x8f   :  { %1062 = vmatprep.subr.bf16.mxu0 %v1162_v26 }
  0x90   :  { %800 = vmatmul.mubr.msk.f32.gmra.mrb[6].mxu0 %vm127_vm14, %v1161_v44  ;;  %808 = vmatmul.mubr.msk.f32.gmra.mrb[6].mxu1 %vm129_vm15, %v1161_v44 }
  0x92   :  { %1064 = vmatpush3.bf16.msra.mxu0 %v1063_v35 }
  0x93   :  { %1065 = vmatprep.subr.bf16.mxu0 %v1162_v26 }
 0x157   :  { %v849_v47 = vpop.f32.mrb[0].mxu0  ;;  %v893_v48 = vpop.f32.mrb[0].mxu1 }
 0x158   :  { %v850_v49 = vpop.f32.mrb[1].mxu0  ;;  %v894_v50 = vpop.f32.mrb[1].mxu1 }
 0x159   :  { %v851_v51 = vadd.f32 %v850_v49, %v849_v47  ;;  %v895_v52 = vadd.f32 %v894_v50, %v893_v48 }
 0x15b   :  { %v1418_v53 = vadd.f32 %v895_v52, %v851_v51  ;;  %v852_v54 = vpop.f32.mrb[2].mxu0  ;;  %v896_v55 = vpop.f32.mrb[2].mxu1 }
 0x15c   :  { %v853_v56 = vpop.f32.mrb[3].mxu0  ;;  %v897_v57 = vpop.f32.mrb[3].mxu1 }
 0x15d   :  { %v854_v58 = vadd.f32 %v853_v56, %v852_v54  ;;  %v898_v59 = vadd.f32 %v897_v57, %v896_v55  ;;  %v334_v60 = vsel %vm333_vm0, %v1418_v53, 0.0  ;;  %v345_v61 = vmul.f32 %v1418_v53, %v1418_v53 }
 0x15e   :  { %335 = vadd.xlane.f32.xlu0 %v334_v60 }
 0x15f   :  { %v1424_v62 = vadd.f32 %v898_v59, %v854_v58  ;;  %v855_v63 = vpop.f32.mrb[4].mxu0  ;;  %v899_v0 = vpop.f32.mrb[4].mxu1  ;;  %v346_v1 = vsel %vm333_vm0, %v345_v61, 0.0 }
 0x160   :  { %347 = vadd.xlane.f32.xlu1 %v346_v1  ;;  %v856_v2 = vpop.f32.mrb[5].mxu0  ;;  %v900_v3 = vpop.f32.mrb[5].mxu1 }
 0x161   :  { %v857_v4 = vadd.f32 %v856_v2, %v855_v63  ;;  %v901_v5 = vadd.f32 %v900_v3, %v899_v0  ;;  %v367_v6 = vsel %vm333_vm0, %v1424_v62, 0.0  ;;  %v378_v7 = vmul.f32 %v1424_v62, %v1424_v62 }
 0x162   :  { %368 = vadd.xlane.f32.xlu0 %v367_v6 }
 0x163   :  { %v1431_v8 = vadd.f32 %v901_v5, %v857_v4  ;;  %v858_v9 = vpop.f32.mrb[6].mxu0  ;;  %v902_v10 = vpop.f32.mrb[6].mxu1  ;;  %v379_v13 = vsel %vm333_vm0, %v378_v7, 0.0 }
 0x164   :  { %v859_v11 = vpop.f32.mrb[7].mxu0  ;;  %v903_v12 = vpop.f32.mrb[7].mxu1 }
 0x165   :  { %v860_v14 = vadd.f32 %v859_v11, %v858_v9  ;;  %v904_v15 = vadd.f32 %v903_v12, %v902_v10  ;;  %v405_v16 = vsel %vm333_vm0, %v1431_v8, 0.0  ;;  %v416_v17 = vmul.f32 %v1431_v8, %v1431_v8 }
 0x166   :  { %406 = vadd.xlane.f32.xlu1 %v405_v16  ;;  %380 = vadd.xlane.f32.xlu0 %v379_v13 }
 0x167   :  { %v1438_v18 = vadd.f32 %v904_v15, %v860_v14  ;;  %v417_v20 = vsel %vm333_vm0, %v416_v17, 0.0 }
 0x169   :  { %v443_v19 = vsel %vm333_vm0, %v1438_v18, 0.0  ;;  %v454_v21 = vmul.f32 %v1438_v18, %v1438_v18 }
 0x16a   :  { %444 = vadd.xlane.f32.xlu1 %v443_v19  ;;  %418 = vadd.xlane.f32.xlu0 %v417_v20 }
 0x16b   :  { %v455_v22 = vsel %vm333_vm0, %v454_v21, 0.0 }
 0x16e   :  { %456 = vadd.xlane.f32.xlu0 %v455_v22 }
 0x1eb   :  { %v336_v36 = vpop.xlane.xlu0 %335 }
 0x1ec   :  { %v337_v37 = vrot.slane %v336_v36, 4 }
 0x1ed   :  { %v348_v38 = vpop.xlane.xlu1 %347 }
 0x1ee   :  { %v338_v39 = vadd.f32 %v337_v37, %v336_v36  ;;  %v349_v40 = vrot.slane %v348_v38, 4 }
 0x1ef   :  { %v369_v41 = vpop.xlane.xlu0 %368 }
 0x1f0   :  { %v339_v42 = vrot.slane %v338_v39, 2  ;;  %v350_v43 = vadd.f32 %v349_v40, %v348_v38  ;;  %v370_v44 = vrot.slane %v369_v41, 4 }
 0x1f2   :  { %v351_v45 = vrot.slane %v350_v43, 2  ;;  %v371_v46 = vadd.f32 %v370_v44, %v369_v41  ;;  %v340_v47 = vadd.f32 %v339_v42, %v338_v39 }
 0x1f3   :  { %v407_v48 = vpop.xlane.xlu1 %406  ;;  %v381_v49 = vpop.xlane.xlu0 %380 }
 0x1f4   :  { %v372_v50 = vrot.slane %v371_v46, 2  ;;  %v408_v51 = vrot.slane %v407_v48, 4  ;;  %v382_v52 = vrot.slane %v381_v49, 4  ;;  %v341_v54 = vrot.slane %v340_v47, 1 }
 0x1f5   :  { %v352_v55 = vadd.f32 %v351_v45, %v350_v43 }
 0x1f6   :  { %v409_v56 = vadd.f32 %v408_v51, %v407_v48  ;;  %v383_v57 = vadd.f32 %v382_v52, %v381_v49  ;;  %v342_v58 = vadd.f32 %v341_v54, %v340_v47  ;;  %v373_v59 = vadd.f32 %v372_v50, %v371_v46 }
 0x1f7   :  { %v445_v60 = vpop.xlane.xlu1 %444  ;;  %v419_v61 = vpop.xlane.xlu0 %418  ;;  %v353_v63 = vrot.slane %v352_v55, 1 }
 0x1f8   :  { %v410_v0 = vrot.slane %v409_v56, 2  ;;  %v384_v1 = vrot.slane %v383_v57, 2  ;;  %v446_v2 = vrot.slane %v445_v60, 4  ;;  %v420_v3 = vrot.slane %v419_v61, 4  ;;  %1089 = vpush %v342_v58 }
 0x1f9   :  { %v354_v4 = vadd.f32 %v353_v63, %v352_v55  ;;  %v374_v5 = vrot.slane %v373_v59, 1 }
 0x1fa   :  { %v447_v6 = vadd.f32 %v446_v2, %v445_v60  ;;  %v421_v7 = vadd.f32 %v420_v3, %v419_v61  ;;  %v385_v9 = vadd.f32 %v384_v1, %v383_v57  ;;  %v411_v10 = vadd.f32 %v410_v0, %v409_v56  ;;  %v490_v60 = vld [vmem:[%s1563_s2 + $0x40] sm:$0xff]  ;;  %v491_v61 = vld [vmem:[%s1563_s2 + $0x48] sm:$0xff] }
 0x1fb   :  { %1091 = vpush %v354_v4  ;;  %v457_v11 = vpop.xlane.xlu0 %456  ;;  %v375_v12 = vadd.f32 %v374_v5, %v373_v59  ;;  %v1066_v1 = vpack.c.bf16 %v491_v61, %v490_v60  ;;  %v492_v4 = vld [vmem:[%s1563_s2 + $0x50] sm:$0xff]  ;;  %v493_v5 = vld [vmem:[%s1563_s2 + $0x58] sm:$0xff] }
 0x1fc   :  { %v448_v13 = vrot.slane %v447_v6, 2  ;;  %v422_v14 = vrot.slane %v421_v7, 2  ;;  %v458_v15 = vrot.slane %v457_v11, 4  ;;  %v386_v16 = vrot.slane %v385_v9, 1 }
 0x1fd   :  { %1093 = vpush %v375_v12  ;;  %v412_v17 = vrot.slane %v411_v10, 1  ;;  %1067 = vmatpush3.bf16.msra.mxu0 %v1066_v1 }
 0x1fe   :  { %v459_v19 = vadd.f32 %v458_v15, %v457_v11  ;;  %v387_v20 = vadd.f32 %v386_v16, %v385_v9  ;;  %v423_v21 = vadd.f32 %v422_v14, %v421_v7  ;;  %v449_v22 = vadd.f32 %v448_v13, %v447_v6  ;;  %1068 = vmatprep.subr.bf16.mxu0 %v1162_v26  ;;  %v494_v13 = vld [vmem:[%s1563_s2 + $0x60] sm:$0xff]  ;;  %v495_v14 = vld [vmem:[%s1563_s2 + $0x68] sm:$0xff]  ;;  %v496_v15 = vld [vmem:[%s1563_s2 + $0x70] sm:$0xff] }
 0x1ff   :  { %v413_v23 = vadd.f32 %v412_v17, %v411_v10  ;;  %v1069_v9 = vpack.c.bf16 %v493_v5, %v492_v4  ;;  %v497_v16 = vld [vmem:[%s1563_s2 + $0x78] sm:$0xff]  ;;  %s1166_s2 = smov 64  }
 0x200   :  { %v460_v24 = vrot.slane %v459_v19, 2  ;;  %1095 = vpush %v387_v20  ;;  %v424_v25 = vrot.slane %v423_v21, 1  ;;  %v450_v27 = vrot.slane %v449_v22, 1 }
 0x201   :  { %1097 = vpush %v413_v23  ;;  %1070 = vmatpush3.bf16.msra.mxu0 %v1069_v9 }
 0x202   :  { %v425_v28 = vadd.f32 %v424_v25, %v423_v21  ;;  %v451_v29 = vadd.f32 %v450_v27, %v449_v22  ;;  %v461_v30 = vadd.f32 %v460_v24, %v459_v19  ;;  %1071 = vmatprep.subr.bf16.mxu0 %v1162_v26  ;;  %v1164_v19 = vmov 0.0  }
 0x203   :  { %964 = vmatprep.mubr.msk.f32.mxu0 %vm1163_vm1, %v1164_v19  ;;  %975 = vmatprep.mubr.msk.f32.mxu1 %vm1163_vm1, %v1164_v19  ;;  %v1075_v21 = vpack.c.bf16 %v497_v16, %v496_v15 }
 0x204   :  { %1099 = vpush %v425_v28  ;;  %v462_v31 = vrot.slane %v461_v30, 1 }
 0x205   :  { %1101 = vpush %v451_v29 }
 0x206   :  { %v463_v32 = vadd.f32 %v462_v31, %v461_v30 }
 0x208   :  { %1103 = vpush %v463_v32  ;;  %v582_v32 = vld [vmem:[%s1565_s4 + $0x8] sm:$0xff] }
 0x229   :  { %s1090_s18 = spop %1089 }
 0x22a   :  { %v344_v33 = vstv %s1090_s18  ;;  %s1165_s18 = smov 32  }
 0x22b   :  { %v357_v34 = vmul.f32 0.00390625, %v344_v33  ;;  %v583_v33 = vld [vmem:[%s1565_s4 + $0x10] sm:$0xff] }
 0x22c   :  { %s1092_s19 = spop %1091 }
 0x22d   :  { %v359_v35 = vmul.f32 %v357_v34, %v357_v34  ;;  %v356_v36 = vstv %s1092_s19  ;;  %v362_v6 = vsub.f32 %v1418_v53, %v357_v34  ;;  %v1072_v53 = vpack.c.bf16 %v495_v14, %v494_v13  ;;  %s1167_s19 = smov 96  }
 0x22e   :  { %v358_v37 = vmul.f32 0.00390625, %v356_v36  ;;  %s1094_s20 = spop %1093 }
 0x22f   :  { %v377_v38 = vstv %s1094_s20  ;;  %1073 = vmatpush3.bf16.msra.mxu0 %v1072_v53 }
 0x230   :  { %v360_v39 = vsub.f32 %v358_v37, %v359_v35  ;;  %v390_v40 = vmul.f32 0.00390625, %v377_v38  ;;  %1074 = vmatprep.subr.bf16.mxu0 %v1162_v26  ;;  %v584_v35 = vld [vmem:[%s1565_s4 + $0x18] sm:$0xff]  ;;  %v809_v37 = vld [vmem:[%s1564_s3] ss:$0 sm:$0xff] }
 0x231   :  { %s1096_s0 = spop %1095  ;;  %v1081_v36 = vpack.c.bf16 %v584_v35, %v583_v33 }
 0x232   :  { %v361_v41 = vmax.f32 %v360_v39, 0.0  ;;  %v389_v42 = vstv %s1096_s0  ;;  %s1098_s21 = spop %1097  ;;  %v392_v43 = vmul.f32 %v390_v40, %v390_v40  ;;  %v395_v17 = vsub.f32 %v1424_v62, %v390_v40 }
 0x233   :  { %v391_v44 = vmul.f32 0.00390625, %v389_v42  ;;  %v415_v45 = vstv %s1098_s21  ;;  %1076 = vmatpush3.bf16.msra.mxu0 %v1075_v21 }
 0x234   :  { %v363_v46 = vadd.f32 1e-05, %v361_v41  ;;  %v428_v47 = vmul.f32 0.00390625, %v415_v45  ;;  %v671_v45 = vld [vmem:[%s1567_s6] sm:$0xff] }
 0x235   :  { %v393_v48 = vsub.f32 %v391_v44, %v392_v43  ;;  %s1100_s22 = spop %1099 }
 0x236   :  { %1116 = vrsqrt.f32 %v363_v46  ;;  %v427_v49 = vstv %s1100_s22  ;;  %s1102_s23 = spop %1101  ;;  %v430_v51 = vmul.f32 %v428_v47, %v428_v47  ;;  %v433_v23 = vsub.f32 %v1431_v8, %v428_v47  ;;  %v672_v46 = vld [vmem:[%s1567_s6 + $0x8] sm:$0xff]  ;;  %v673_v47 = vld [vmem:[%s1567_s6 + $0x10] sm:$0xff] }
 0x237   :  { %v394_v50 = vmax.f32 %v393_v48, 0.0  ;;  %v429_v52 = vmul.f32 0.00390625, %v427_v49  ;;  %v453_v54 = vstv %s1102_s23  ;;  %v1084_v48 = vpack.c.bf16 %v672_v46, %v671_v45  ;;  %v674_v49 = vld [vmem:[%s1567_s6 + $0x18] sm:$0xff] }
 0x238   :  { %v466_v55 = vmul.f32 0.00390625, %v453_v54 }
 0x239   :  { %v396_v56 = vadd.f32 1e-05, %v394_v50  ;;  %v431_v57 = vsub.f32 %v429_v52, %v430_v51  ;;  %s1104_s24 = spop %1103  ;;  %v1087_v50 = vpack.c.bf16 %v674_v49, %v673_v47  ;;  %v811_v51 = vld [vmem:[%s1566_s5] ss:$0 sm:$0xff]  ;;  %s1168_s5 = smov [#allocation3]  }
 0x23a   :  { %v468_v58 = vmul.f32 %v466_v55, %v466_v55  ;;  %v465_v59 = vstv %s1104_s24  ;;  %v471_v62 = vsub.f32 %v1438_v18, %v466_v55  ;;  %v581_v18 = vld [vmem:[%s1565_s4] sm:$0xff]  ;;  %s769_s15 = sshll.u32 %s1168_s5, 4  ;;  %s770_s15 = int_to_ptr.vmem [resolvable:$true] %s769_s15 }
 0x23b   :  { %1118 = vrsqrt.f32 %v396_v56  ;;  %v432_v63 = vmax.f32 %v431_v57, 0.0  ;;  %v467_v0 = vmul.f32 0.00390625, %v465_v59  ;;  %v1078_v34 = vpack.c.bf16 %v582_v32, %v581_v18  ;;  %s1136_s16 = scalar_lea.vmem %s770_s15, 128  ;;  %p1141_p1 = scmp.lt.s32.totalorder %s770_s15, %s770_s15 }
 0x23c   :  { %p1137_p0 = scmp.ne.s32.totalorder %s770_s15, %s1136_s16  ;;  %p1142_p2 = scmp.lt.s32.totalorder %s1136_s16, %s1136_s16 }
 0x23d   :  { %v434_v2 = vadd.f32 1e-05, %v432_v63  ;;  %v469_v3 = vsub.f32 %v467_v0, %v468_v58  ;;  %1079 = vmatpush3.bf16.msra.mxu1 %v1078_v34 }
 0x23e   :  { %1080 = vmatprep.subr.bf16.mxu1 %v1162_v26  ;;  %p1143_p3 = por %p1142_p2, %p1141_p1 }
 0x23f   :  { %1120 = vrsqrt.f32 %v434_v2  ;;  %v470_v7 = vmax.f32 %v469_v3, 0.0 }
 0x240   :  { %v1117_v10 = vpop.eup %1116  ;;  %p1144_p4 = pnand %p1143_p3, %p1137_p0 }
 0x241   :  { %v472_v11 = vadd.f32 1e-05, %v470_v7  ;;  %v365_v12 = vmul.f32 %v1117_v10, %v362_v6  ;;  %1082 = vmatpush3.bf16.msra.mxu1 %v1081_v36 }
 0x242   :  { %1083 = vmatprep.subr.bf16.mxu1 %v1162_v26 }
 0x243   :  { %1122 = vrsqrt.f32 %v472_v11  ;;  %366 = vst.msk [vmem:[#allocation2] sm:$0xff] %vm333_vm0, %v365_v12 }
 0x245   :  { %v1119_v20 = vpop.eup %1118 }
 0x246   :  { %v398_v22 = vmul.f32 %v1119_v20, %v395_v17 }
 0x248   :  { %400 = vrot.lane.b32.xlu1 %v398_v22, %s1165_s18 }
 0x249   :  { %v1121_v24 = vpop.eup %1120 }
 0x24a   :  { %v436_v25 = vmul.f32 %v1121_v24, %v433_v23 }
 0x24c   :  { %438 = vrot.lane.b32.xlu0 %v436_v25, %s1166_s2 }
 0x24d   :  { %v1123_v27 = vpop.eup %1122 }
 0x24e   :  { %v474_v28 = vmul.f32 %v1123_v27, %v471_v62 }
 0x250   :  { %476 = vrot.lane.b32.xlu1 %v474_v28, %s1167_s19 }
 0x2ba   :  { %v401_v29 = vpop.permute.xlu1 %400 }
 0x2bb   :  { %404 = vst.msk [vmem:[#allocation2] sm:$0xff] %vm403_vm2, %v401_v29 }
 0x2be   :  { %v439_v30 = vpop.permute.xlu0 %438 }
 0x2bf   :  { %442 = vst.msk [vmem:[#allocation2] sm:$0xff] %vm441_vm3, %v439_v30 }
 0x2c2   :  { %v477_v8 = vpop.permute.xlu1 %476 }
 0x2c3   :  { %480 = vst.msk [vmem:[#allocation2] sm:$0xff] %vm479_vm4, %v477_v8 }
 0x2ca   :  { %v481_v31 = vld [vmem:[#allocation2] sm:$0xff] }
 0x2cb   :  { %965 = vmatmul.mubr.f32.vlgmr.msra.gmra.mrb[8].mxu0 %v481_v31 }
 0x39e   :  { %v571_v38 = vpop.f32.mrb[8].mxu0 }
 0x39f   :  { %v572_v39 = vadd.f32 %v809_v37, %v571_v38  ;;  %v966_v40 = vpop.f32.mrb[9].mxu0 }
 0x3a1   :  { %v810_v41 = vmul.f32 -1.442695, %v572_v39 }
 0x3a3   :  { %1124 = vpow2.f32 %v810_v41 }
 0x3ad   :  { %v1125_v42 = vpop.eup %1124 }
 0x3ae   :  { %v578_v43 = vadd.f32 1.0, %v1125_v42 }
 0x3b0   :  { %1126 = vrcp.f32 %v578_v43 }
 0x3ba   :  { %v1127_v44 = vpop.eup %1126 }
 0x3bb   :  { %976 = vmatmul.mubr.msk.f32.vlgmr.msra.gmra.mrb[8].mxu1 %vm333_vm0, %v1127_v44 }
 0x3bc   :  { %986 = vmatprep.mubr.msk.f32.mxu1 %vm1163_vm1, %v1164_v19  ;;  %1085 = vmatpush3.bf16.msra.mxu1 %v1084_v48 }
 0x3bd   :  { %1086 = vmatprep.subr.bf16.mxu1 %v1162_v26  ;;  %v814_v26 = vld [vmem:[%s1568_s7] ss:$0 sm:$0xff] }
 0x3c0   :  { %1088 = vmatpush3.bf16.msra.mxu1 %v1087_v50 }
 0x48e   :  { %v661_v52 = vpop.f32.mrb[8].mxu1 }
 0x48f   :  { %v662_v54 = vadd.f32 %v811_v51, %v661_v52  ;;  %v977_v55 = vpop.f32.mrb[9].mxu1 }
 0x491   :  { %v813_v56 = vmul.f32 -1.442695, %v662_v54 }
 0x493   :  { %1128 = vpow2.f32 %v813_v56 }
 0x49d   :  { %v1129_v57 = vpop.eup %1128 }
 0x49e   :  { %v668_v58 = vadd.f32 1.0, %v1129_v57 }
 0x4a0   :  { %1130 = vrcp.f32 %v668_v58 }
 0x4aa   :  { %v1131_v59 = vpop.eup %1130 }
 0x4ab   :  { %987 = vmatmul.mubr.msk.f32.vlgmr.msra.gmra.mrb[10].mxu1 %vm333_vm0, %v1131_v59 }
 0x57e   :  { %v751_v60 = vpop.f32.mrb[10].mxu1 }
 0x57f   :  { %v752_v61 = vadd.f32 %v814_v26, %v751_v60  ;;  %v988_v63 = vpop.f32.mrb[11].mxu1 }
 0x581   :  { %v816_v0 = vmul.f32 -1.442695, %v752_v61 }
 0x583   :  { %1132 = vpow2.f32 %v816_v0 }
 0x58d   :  { %v1133_v1 = vpop.eup %1132 }
 0x58e   :  { %v758_v2 = vadd.f32 1.0, %v1133_v1 }
 0x590   :  { %1134 = vrcp.f32 %v758_v2 }
 0x59a   :  { %v1135_v3 = vpop.eup %1134 }
 0x59b   :  { %762 = vst.msk [vmem:[#allocation3] sm:$0xff] %vm761_vm5, %v1135_v3 }
 0x59c   :  { %1147 = shalt.err (!%p1144_p4)
}
 0x59d   :  { %s1148_s18 = scalar_lea.hbm %s1569_s8, 128 }
 0x59e   :  { %p1149_p5 = scmp.ne.s32.totalorder %s1569_s8, %s1148_s18  ;;  %p1152_p6 = scmp.lt.u32.totalorder %s1148_s18, %s1569_s8 }
 0x5a0   :  { %p1154_p7 = pnand %p1152_p6, %p1149_p5 }
 0x5a2   :  { %1157 = shalt.err (!%p1154_p7)
}
 0x5a3   :  { %772 = dma.vmem_to_hbm [thread:$0]  %s770_s15, 128, %s1569_s8, [#allocation4]  }
 0x5a4   :  { %1158 = dma.done.wait [#allocation4], 128  }
 0x5a5   :  { %1159 = vsyncadd [#allocation4], 4294967168 }
 0x5a6   :  { %776 = vsyncpa [#allocation4], 1 }

</bundles_post_ra>
